<compile_context>
chip_gen: v7x
topology: tpu7x:2x2x1
jax: 0.10.0
libtpu: 0.0.40
codegen_flags: <defaults>
</compile_context>

<pallas_src>
import jax
import jax.numpy as jnp
from jax.experimental import pallas as pl
from jax.experimental.pallas import tpu as pltpu


def _ensure_tuple(v, n):
    if isinstance(v, (tuple, list)):
        assert len(v) == n
        return tuple(v)
    return (v,) * n


def _round_up(x, m):
    return ((x + m - 1) // m) * m


def _choose_m_tile(m):
    # Pick an M tile (multiple of 128, <= 512) minimizing zero padding; prefer larger tiles.
    best_tm, best_pad = 128, _round_up(m, 128)
    for tm in (256, 384, 512):
        mp = _round_up(m, tm)
        if mp <= best_pad:
            best_tm, best_pad = tm, mp
    return best_tm, best_pad


def _choose_n_tile(n_padded):
    # n_padded is a multiple of 128. Keep the whole (K, N) weight block resident when small;
    # otherwise tile N lane-densely.
    if n_padded <= 1024:
        return n_padded
    for tn in (1024, 512, 256, 128):
        if n_padded % tn == 0:
            return tn
    return 128


# ---------------- Pallas kernel: tiled (patches x embed_dim) projection ----------------

def _proj_kernel(x_ref, w_ref, b_ref, o_ref):
    # x_ref: (tm, K) compute dtype, w_ref: (K, tn) compute dtype,
    # b_ref: (1, tn) f32, o_ref: (tm, tn) output dtype.
    acc = jnp.dot(x_ref[...], w_ref[...], preferred_element_type=jnp.float32)
    o_ref[...] = (acc + b_ref[...]).astype(o_ref.dtype)


def _patch_proj(patches, weight_mat, bias_row, out_dtype, *, tm, tn):
    # patches: (M_pad, K), weight_mat: (K, N_pad), bias_row: (1, N_pad) -> (M_pad, N_pad)
    M, K = patches.shape
    Kw, N = weight_mat.shape
    assert Kw == K and M % tm == 0 and N % tn == 0
    return pl.pallas_call(
        _proj_kernel,
        out_shape=jax.ShapeDtypeStruct((M, N), out_dtype),
        grid_spec=pltpu.PrefetchScalarGridSpec(
            num_scalar_prefetch=0,
            grid=(M // tm, N // tn),
            in_specs=[
                pl.BlockSpec((tm, K), lambda i, j: (i, 0)),   # LHS tile, full K
                pl.BlockSpec((K, tn), lambda i, j: (0, j)),   # weight: resident across M axis
                pl.BlockSpec((1, tn), lambda i, j: (0, j)),   # bias row (f32)
            ],
            out_specs=pl.BlockSpec((tm, tn), lambda i, j: (i, j)),
        ),
        compiler_params=pltpu.CompilerParams(
            dimension_semantics=("parallel", "parallel")),
    )(patches, weight_mat, bias_row)


# ---------------- PatchEmbed module (JAX glue around the Pallas kernel) ----------------

class PatchEmbed:
    """Image to Patch Embedding (Conv2d with stride == kernel_size)."""

    def __init__(self, img_size=224, patch_size=16, in_chans=3, embed_dim=768,
                 bias=True, dynamic_pad=False, *, key=None,
                 dtype=jnp.float32, compute_dtype=jnp.bfloat16):
        self.img_size = _ensure_tuple(img_size, 2)
        self.patch_size = _ensure_tuple(patch_size, 2)
        self.num_patches = (self.img_size[0] // self.patch_size[0]) * \
                           (self.img_size[1] // self.patch_size[1])
        self.dynamic_pad = dynamic_pad
        self.in_chans = in_chans
        self.embed_dim = embed_dim
        self.compute_dtype = compute_dtype if compute_dtype is not None else dtype

        ph, pw = self.patch_size
        if key is None:
            key = jax.random.PRNGKey(0)
        k_w, k_b = jax.random.split(key)
        fan_in = in_chans * ph * pw
        bound = 1.0 / (fan_in ** 0.5)
        # Conv2d weight layout (embed_dim, in_chans, ph, pw), as in PyTorch.
        self.weight = jax.random.uniform(
            k_w, (embed_dim, in_chans, ph, pw), dtype, minval=-bound, maxval=bound)
        if bias:
            self.bias = jax.random.uniform(
                k_b, (embed_dim,), dtype, minval=-bound, maxval=bound)
        else:
            self.bias = jnp.zeros((embed_dim,), dtype)

        # Matmul-form weight: (K, N) with K flatten order (c, kh, kw) to match the conv,
        # padded to lane-dense N (multiple of 128), stored in the compute dtype.
        K = in_chans * ph * pw
        self.n_padded = _round_up(embed_dim, 128)
        wm = self.weight.reshape(embed_dim, K).T                      # (K, N)
        wm = jnp.pad(wm, ((0, 0), (0, self.n_padded - embed_dim)))
        self.weight_mat = wm.astype(self.compute_dtype)
        br = self.bias.reshape(1, embed_dim).astype(jnp.float32)      # bias kept in f32
        self.bias_row = jnp.pad(br, ((0, 0), (0, self.n_padded - embed_dim)))

    def __call__(self, x):
        # x: (B, C, H, W)  [NCHW]
        B, C, H, W = x.shape
        ph, pw = self.patch_size
        out_dtype = x.dtype
        if self.dynamic_pad:
            pad_h = (ph - H % ph) % ph
            pad_w = (pw - W % pw) % pw
            x = jnp.pad(x, ((0, 0), (0, 0), (0, pad_h), (0, pad_w)))
            H, W = H + pad_h, W + pad_w

        gh, gw = H // ph, W // pw
        num_patches = gh * gw

        # Cast first so the materialized patchify copy is in the (narrower) compute dtype.
        # TODO(synk): fuse the NCHW patchify gather into the kernel (grid over (B, gh) with a
        # (1, C, ph, W) block) to remove this HBM-bound pre-pass entirely.
        xc = x.astype(self.compute_dtype)
        patches = xc.reshape(B, C, gh, ph, gw, pw)
        patches = patches.transpose(0, 2, 4, 1, 3, 5)                 # (B, gh, gw, C, ph, pw)
        patches = patches.reshape(B * num_patches, C * ph * pw)       # (M, K), order (c,kh,kw)

        M = B * num_patches
        tm, m_padded = _choose_m_tile(M)
        if m_padded != M:
            patches = jnp.pad(patches, ((0, m_padded - M), (0, 0)))
        tn = _choose_n_tile(self.n_padded)

        out = _patch_proj(patches, self.weight_mat, self.bias_row, out_dtype, tm=tm, tn=tn)
        out = out[:M, :self.embed_dim]
        # == conv(x).flatten(2).transpose(1, 2)
        return out.reshape(B, num_patches, self.embed_dim)


# -------------------------------------- demo --------------------------------------

if __name__ == "__main__":
    key = jax.random.PRNGKey(0)
    k_param, k_x = jax.random.split(key)

    B, C, H, W = 2, 4, 16, 16
    patch = 4
    embed_dim = 32

    x = jax.random.normal(k_x, (B, C, H, W), jnp.float32)

    # f32 compute path: bit-faithful to the PyTorch module, checked tightly.
    mod_f32 = PatchEmbed(img_size=(H, W), patch_size=patch, in_chans=C,
                         embed_dim=embed_dim, bias=True, key=k_param,
                         compute_dtype=jnp.float32)
    out_f32 = jax.block_until_ready(mod_f32(x))

    # Default fast path: bf16 operands, f32 accumulation (perf config for v5e/v6e/v7x).
    mod_bf16 = PatchEmbed(img_size=(H, W), patch_size=patch, in_chans=C,
                          embed_dim=embed_dim, bias=True, key=k_param)
    out_bf16 = jax.block_until_ready(mod_bf16(x))

    # Reference: plain-JAX strided conv (NCHW, OIHW) -> flatten(2) -> transpose(1,2)
    ref = jax.lax.conv_general_dilated(
        x, mod_f32.weight, window_strides=(patch, patch), padding="VALID",
        dimension_numbers=("NCHW", "OIHW", "NCHW"))
    ref = ref + mod_f32.bias[None, :, None, None]
    ref = ref.reshape(B, embed_dim, -1).transpose(0, 2, 1)

    expected_shape = (B, (H // patch) * (W // patch), embed_dim)
    assert out_f32.shape == expected_shape, out_f32.shape
    assert out_bf16.shape == expected_shape, out_bf16.shape
    assert jnp.allclose(out_f32, ref, atol=1e-5, rtol=1e-5), \
        float(jnp.abs(out_f32 - ref).max())
    assert jnp.allclose(out_bf16, ref, atol=5e-2, rtol=5e-2), \
        float(jnp.abs(out_bf16 - ref).max())

    print("KERNEL_OK")
</pallas_src>

<mosaic_0001>
module attributes {stable_mosaic.version = 11 : i64} {
  func.func @_proj_kernel(%arg0: i32, %arg1: i32, %arg2: memref<128x64xf32, #tpu.memory_space<vmem>>, %arg3: memref<64x128xf32, #tpu.memory_space<vmem>>, %arg4: memref<1x128xf32, #tpu.memory_space<vmem>>, %arg5: memref<128x128xf32, #tpu.memory_space<vmem>>) attributes {dimension_semantics = [#tpu.dimension_semantics<parallel>, #tpu.dimension_semantics<parallel>], iteration_bounds = array<i64: 1, 1>, scalar_prefetch = 0 : i64, scratch_operands = 0 : i64, tpu.core_type = #tpu.core_type<tc>, window_params = [{transform_indices = @transform_0, window_bounds = array<i64: 128, 64>}, {transform_indices = @transform_1, window_bounds = array<i64: 64, 128>}, {transform_indices = @transform_2, window_bounds = array<i64: 1, 128>}, {transform_indices = @transform_3, window_bounds = array<i64: 128, 128>}]} {
    %c0 = arith.constant 0 : index
    %c0_0 = arith.constant 0 : index
    %0 = vector.load %arg2[%c0, %c0_0] : memref<128x64xf32, #tpu.memory_space<vmem>>, vector<128x64xf32>
    %c0_1 = arith.constant 0 : index
    %c0_2 = arith.constant 0 : index
    %1 = vector.load %arg3[%c0_1, %c0_2] : memref<64x128xf32, #tpu.memory_space<vmem>>, vector<64x128xf32>
    %cst = arith.constant dense<0.000000e+00> : vector<128x128xf32>
    %2 = tpu.matmul %0, %1, %cst {dimension_numbers = #tpu.dot_dimension_numbers<[1], [0], [0], [1], [0, 0, 1, 1], [], []>} : vector<128x64xf32>, vector<64x128xf32>, vector<128x128xf32> -> vector<128x128xf32>
    %c0_3 = arith.constant 0 : index
    %c0_4 = arith.constant 0 : index
    %3 = vector.load %arg4[%c0_3, %c0_4] : memref<1x128xf32, #tpu.memory_space<vmem>>, vector<1x128xf32>
    %4 = vector.broadcast %3 : vector<1x128xf32> to vector<128x128xf32>
    %5 = arith.addf %2, %4 : vector<128x128xf32>
    %c0_5 = arith.constant 0 : index
    %c0_6 = arith.constant 0 : index
    %6 = vector.load %arg5[%c0_5, %c0_6] : memref<128x128xf32, #tpu.memory_space<vmem>>, vector<128x128xf32>
    tpu.vector_store %arg5[%c0_5, %c0_6], %5 {strides = array<i32>} : memref<128x128xf32, #tpu.memory_space<vmem>>, vector<128x128xf32>,
    return
  }
  func.func @transform_0(%arg0: i32, %arg1: i32) -> (i32, i32) {
    %c0_i32 = arith.constant 0 : i32
    %c0_i32_0 = arith.constant 0 : i32
    return %arg0, %c0_i32 : i32, i32
  }
  func.func @transform_1(%arg0: i32, %arg1: i32) -> (i32, i32) {
    %c0_i32 = arith.constant 0 : i32
    %c0_i32_0 = arith.constant 0 : i32
    return %c0_i32, %arg1 : i32, i32
  }
  func.func @transform_2(%arg0: i32, %arg1: i32) -> (i32, i32) {
    %c0_i32 = arith.constant 0 : i32
    %c0_i32_0 = arith.constant 0 : i32
    return %c0_i32, %arg1 : i32, i32
  }
  func.func @transform_3(%arg0: i32, %arg1: i32) -> (i32, i32) {
    %c0_i32 = arith.constant 0 : i32
    return %arg0, %arg1 : i32, i32
  }
}

</mosaic_0001>

<bundles_post_ra>
// kernel: tpu_custom_call.1
= control target key start
LH: loop header
LB: loop body
LE: loop exit
PB: predicated region body
PF: predicated region fallthrough
CT: control target
= control target key end

     0   :  { %vm46_vm0 = vcmask 523264   ;;  %s530_s0 = inlined_call_operand.vmem [shape: f32[128,64], index: 0, kind: input, shape index: {}]   ;;  %s531_s1 = inlined_call_operand.vmem [shape: f32[64,128], index: 1, kind: input, shape index: {}]   ;;  %s532_s2 = inlined_call_operand.vmem [shape: f32[1,128], index: 2, kind: input, shape index: {}]   ;;  %s533_s3 = inlined_call_operand.hbm [shape: f32[128,128], index: 3, kind: output, shape index: {}]  }
   0x1   :  { %v31_v0 = vld [vmem:[%s531_s1] sm:$0xff]  ;;  %v32_v1 = vld [vmem:[%s531_s1 + $0x8] sm:$0xff]  ;;  %v33_v2 = vld [vmem:[%s531_s1 + $0x10] sm:$0xff] }
   0x2   :  { %v353_v3 = vpack.c.bf16 %v32_v1, %v31_v0  ;;  %v34_v4 = vld [vmem:[%s531_s1 + $0x18] sm:$0xff]  ;;  %v35_v6 = vld [vmem:[%s531_s1 + $0x20] sm:$0xff]  ;;  %v36_v7 = vld [vmem:[%s531_s1 + $0x28] sm:$0xff] }
   0x3   :  { %v357_v5 = vpack.c.bf16 %v34_v4, %v33_v2  ;;  %v15_v8 = vld [vmem:[%s530_s0] sm:$0xff]  ;;  %v361_v10 = vpack.c.bf16 %v36_v7, %v35_v6  ;;  %v37_v11 = vld [vmem:[%s531_s1 + $0x30] sm:$0xff]  ;;  %v38_v12 = vld [vmem:[%s531_s1 + $0x38] sm:$0xff] }
   0x4   :  { %354 = vmatprep.subr.bf16.mxu0 %v353_v3  ;;  %369 = vmatprep.subr.bf16.mxu1 %v353_v3  ;;  %v23_v9 = vld [vmem:[%s530_s0 + $0x40] sm:$0xff] }
   0x5   :  { %356 = vmatpush3.bf16.msra.mxu0 %v353_v3  ;;  %373 = vmatpush3.bf16.msra.mxu1 %v353_v3 }
   0x6   :  { %358 = vmatprep.subr.bf16.mxu0 %v357_v5  ;;  %370 = vmatprep.subr.bf16.mxu1 %v357_v5 }
   0x7   :  { %329 = vmatprep.mubr.msk.f32.mxu0 %vm46_vm0, %v15_v8  ;;  %341 = vmatprep.mubr.msk.f32.mxu1 %vm46_vm0, %v23_v9 }
   0x9   :  { %360 = vmatpush3.bf16.msra.mxu0 %v357_v5  ;;  %374 = vmatpush3.bf16.msra.mxu1 %v357_v5 }
   0xa   :  { %8 = vsyncpa [#allocation3], 0  ;;  %362 = vmatprep.subr.bf16.mxu0 %v361_v10  ;;  %371 = vmatprep.subr.bf16.mxu1 %v361_v10  ;;  %v365_v13 = vpack.c.bf16 %v38_v12, %v37_v11  ;;  %v16_v14 = vld [vmem:[%s530_s0 + $0x8] sm:$0xff]  ;;  %v17_v16 = vld [vmem:[%s530_s0 + $0x10] sm:$0xff] }
   0xb   :  { %v24_v15 = vld [vmem:[%s530_s0 + $0x48] sm:$0xff]  ;;  %v25_v17 = vld [vmem:[%s530_s0 + $0x50] sm:$0xff]  ;;  %v18_v18 = vld [vmem:[%s530_s0 + $0x18] sm:$0xff] }
   0xc   :  { %v26_v19 = vld [vmem:[%s530_s0 + $0x58] sm:$0xff]  ;;  %v19_v20 = vld [vmem:[%s530_s0 + $0x20] sm:$0xff]  ;;  %v20_v22 = vld [vmem:[%s530_s0 + $0x28] sm:$0xff] }
   0xd   :  { %364 = vmatpush3.bf16.msra.mxu0 %v361_v10  ;;  %375 = vmatpush3.bf16.msra.mxu1 %v361_v10  ;;  %v27_v21 = vld [vmem:[%s530_s0 + $0x60] sm:$0xff]  ;;  %v28_v23 = vld [vmem:[%s530_s0 + $0x68] sm:$0xff]  ;;  %v21_v24 = vld [vmem:[%s530_s0 + $0x30] sm:$0xff] }
   0xe   :  { %366 = vmatprep.subr.bf16.mxu0 %v365_v13  ;;  %372 = vmatprep.subr.bf16.mxu1 %v365_v13  ;;  %v29_v25 = vld [vmem:[%s530_s0 + $0x70] sm:$0xff]  ;;  %v22_v26 = vld [vmem:[%s530_s0 + $0x38] sm:$0xff]  ;;  %v272_v28 = vld [vmem:[%s532_s2] ss:$0 sm:$0xff] }
   0xf   :  { %v30_v27 = vld [vmem:[%s530_s0 + $0x78] sm:$0xff]  ;;  %s404_s0 = smov [#allocation2]  }
  0x10   :  { %s261_s2 = sshll.u32 %s404_s0, 4  ;;  %s262_s2 = int_to_ptr.vmem [resolvable:$true] %s261_s2 }
  0x11   :  { %368 = vmatpush3.bf16.msra.mxu0 %v365_v13  ;;  %376 = vmatpush3.bf16.msra.mxu1 %v365_v13  ;;  %s380_s1 = scalar_lea.vmem %s262_s2, 2048  ;;  %p385_p1 = scmp.lt.s32.totalorder %s262_s2, %s262_s2 }
  0x12   :  { %p381_p0 = scmp.ne.s32.totalorder %s262_s2, %s380_s1  ;;  %p386_p2 = scmp.lt.s32.totalorder %s380_s1, %s380_s1 }
  0x14   :  { %330 = vmatmul.mubr.msk.f32.vlgmr.msra.gmra.mrb[0].mxu0 %vm46_vm0, %v16_v14  ;;  %342 = vmatmul.mubr.msk.f32.vlgmr.msra.gmra.mrb[0].mxu1 %vm46_vm0, %v24_v15  ;;  %p387_p3 = por %p386_p2, %p385_p1 }
  0x15   :  { %332 = vmatprep.mubr.msk.f32.mxu0 %vm46_vm0, %v17_v16  ;;  %344 = vmatprep.mubr.msk.f32.mxu1 %vm46_vm0, %v25_v17 }
  0x16   :  { %p388_p4 = pnand %p387_p3, %p381_p0 }
  0x18   :  { %333 = vmatmul.mubr.msk.f32.gmra.mrb[2].mxu0 %vm46_vm0, %v18_v18  ;;  %345 = vmatmul.mubr.msk.f32.gmra.mrb[2].mxu1 %vm46_vm0, %v26_v19 }
  0x19   :  { %335 = vmatprep.mubr.msk.f32.mxu0 %vm46_vm0, %v19_v20  ;;  %347 = vmatprep.mubr.msk.f32.mxu1 %vm46_vm0, %v27_v21 }
  0x1c   :  { %336 = vmatmul.mubr.msk.f32.gmra.mrb[4].mxu0 %vm46_vm0, %v20_v22  ;;  %348 = vmatmul.mubr.msk.f32.gmra.mrb[4].mxu1 %vm46_vm0, %v28_v23 }
  0x1d   :  { %338 = vmatprep.mubr.msk.f32.mxu0 %vm46_vm0, %v21_v24  ;;  %350 = vmatprep.mubr.msk.f32.mxu1 %vm46_vm0, %v29_v25 }
  0x20   :  { %339 = vmatmul.mubr.msk.f32.gmra.mrb[6].mxu0 %vm46_vm0, %v22_v26  ;;  %351 = vmatmul.mubr.msk.f32.gmra.mrb[6].mxu1 %vm46_vm0, %v30_v27 }
  0xe7   :  { %v331_v29 = vpop.f32.mrb[0].mxu0  ;;  %v343_v30 = vpop.f32.mrb[0].mxu1 }
  0xe8   :  { %v167_v31 = vadd.f32 %v331_v29, %v272_v28  ;;  %v207_v32 = vadd.f32 %v343_v30, %v272_v28  ;;  %v161_v33 = vpop.f32.mrb[1].mxu0  ;;  %v201_v34 = vpop.f32.mrb[1].mxu1 }
  0xe9   :  { %v162_v35 = vadd.f32 %v272_v28, %v161_v33  ;;  %v202_v36 = vadd.f32 %v272_v28, %v201_v34 }
  0xea   :  { %241 = vst [vmem:[#allocation2 + $0x8] sm:$0xff] %v167_v31  ;;  %249 = vst [vmem:[#allocation2 + $0x48] sm:$0xff] %v207_v32 }
  0xeb   :  { %240 = vst [vmem:[#allocation2] sm:$0xff] %v162_v35  ;;  %248 = vst [vmem:[#allocation2 + $0x40] sm:$0xff] %v202_v36  ;;  %v334_v37 = vpop.f32.mrb[2].mxu0  ;;  %v346_v38 = vpop.f32.mrb[2].mxu1 }
  0xec   :  { %v177_v39 = vadd.f32 %v334_v37, %v272_v28  ;;  %v217_v40 = vadd.f32 %v346_v38, %v272_v28  ;;  %v171_v41 = vpop.f32.mrb[3].mxu0  ;;  %v211_v42 = vpop.f32.mrb[3].mxu1 }
  0xed   :  { %v172_v43 = vadd.f32 %v272_v28, %v171_v41  ;;  %v212_v44 = vadd.f32 %v272_v28, %v211_v42 }
  0xee   :  { %243 = vst [vmem:[#allocation2 + $0x18] sm:$0xff] %v177_v39  ;;  %251 = vst [vmem:[#allocation2 + $0x58] sm:$0xff] %v217_v40 }
  0xef   :  { %242 = vst [vmem:[#allocation2 + $0x10] sm:$0xff] %v172_v43  ;;  %250 = vst [vmem:[#allocation2 + $0x50] sm:$0xff] %v212_v44  ;;  %v337_v45 = vpop.f32.mrb[4].mxu0  ;;  %v349_v46 = vpop.f32.mrb[4].mxu1 }
  0xf0   :  { %v187_v47 = vadd.f32 %v337_v45, %v272_v28  ;;  %v227_v48 = vadd.f32 %v349_v46, %v272_v28  ;;  %v181_v49 = vpop.f32.mrb[5].mxu0  ;;  %v221_v50 = vpop.f32.mrb[5].mxu1 }
  0xf1   :  { %v182_v51 = vadd.f32 %v272_v28, %v181_v49  ;;  %v222_v52 = vadd.f32 %v272_v28, %v221_v50 }
  0xf2   :  { %245 = vst [vmem:[#allocation2 + $0x28] sm:$0xff] %v187_v47  ;;  %253 = vst [vmem:[#allocation2 + $0x68] sm:$0xff] %v227_v48 }
  0xf3   :  { %244 = vst [vmem:[#allocation2 + $0x20] sm:$0xff] %v182_v51  ;;  %252 = vst [vmem:[#allocation2 + $0x60] sm:$0xff] %v222_v52  ;;  %v340_v53 = vpop.f32.mrb[6].mxu0  ;;  %v352_v54 = vpop.f32.mrb[6].mxu1 }
  0xf4   :  { %v197_v55 = vadd.f32 %v340_v53, %v272_v28  ;;  %v237_v56 = vadd.f32 %v352_v54, %v272_v28  ;;  %v191_v57 = vpop.f32.mrb[7].mxu0  ;;  %v231_v58 = vpop.f32.mrb[7].mxu1 }
  0xf5   :  { %v192_v59 = vadd.f32 %v272_v28, %v191_v57  ;;  %v232_v60 = vadd.f32 %v272_v28, %v231_v58 }
  0xf6   :  { %247 = vst [vmem:[#allocation2 + $0x38] sm:$0xff] %v197_v55  ;;  %255 = vst [vmem:[#allocation2 + $0x78] sm:$0xff] %v237_v56 }
  0xf7   :  { %246 = vst [vmem:[#allocation2 + $0x30] sm:$0xff] %v192_v59  ;;  %254 = vst [vmem:[#allocation2 + $0x70] sm:$0xff] %v232_v60 }
  0xf8   :  { %391 = shalt.err (!%p388_p4)
}
  0xf9   :  { %s392_s9 = scalar_lea.hbm %s533_s3, 2048 }
  0xfa   :  { %p393_p5 = scmp.ne.s32.totalorder %s533_s3, %s392_s9  ;;  %p396_p6 = scmp.lt.u32.totalorder %s392_s9, %s533_s3 }
  0xfc   :  { %p398_p7 = pnand %p396_p6, %p393_p5 }
  0xfe   :  { %401 = shalt.err (!%p398_p7)
}
  0xff   :  { %s405_s14 = smov 128   ;;  %s406_s15 = smov 8  }
 0x100   :  { %267 = dma.vmem_to_hbm [thread:$0]  %s262_s2, 2048, %s533_s3, [#allocation3], %s405_s14, %s405_s14, %s406_s15  }
 0x101   :  { %402 = dma.done.wait [#allocation3], 2048  }
 0x102   :  { %403 = vsyncadd [#allocation3], 4294965248 }
 0x103   :  { %271 = vsyncpa [#allocation3], 1 }

</bundles_post_ra>
